<compile_context>
chip_gen: v7x
topology: tpu7x:2x2x1
jax: 0.10.0
libtpu: 0.0.40
codegen_flags: <defaults>
</compile_context>

<pallas_src>
import functools

import jax
import jax.numpy as jnp
from jax.experimental import pallas as pl
from jax.experimental.pallas import tpu as pltpu


# ---------------------------------------------------------------------------
# Fused depthwise + pointwise kernel
# ---------------------------------------------------------------------------

def _dsc_fused_kernel(x_ref, dw_ref, pw_ref, o_ref, *,
                      kernel_size, stride, block_rows, out_w, compute_dtype):
    """One (image, output-row-tile) step: depthwise kxk (VPU) -> pointwise 1x1 (MXU)."""
    k = kernel_size
    s = stride
    th = block_rows            # output rows handled by this grid step
    wo = out_w
    cin = x_ref.shape[-1]

    t = pl.program_id(1)
    row_start = t * th * s     # first padded-input row needed by this tile

    taps = dw_ref[...].astype(jnp.float32)                 # (k*k, Cin)
    acc = jnp.zeros((th, wo, cin), jnp.float32)

    if s == 1:
        # One dynamic-start load of the rows this tile needs, then static tap slices.
        xt = x_ref[0, pl.ds(row_start, th + k - 1), :, :]  # (th+k-1, Wp, Cin)
        for kk in range(k * k):
            dy, dx = divmod(kk, k)
            acc = acc + xt[dy:dy + th, dx:dx + wo, :].astype(jnp.float32) * taps[kk]
    else:
        # Strided windows straight from the ref: only Ho*Wo outputs are computed.
        for kk in range(k * k):
            dy, dx = divmod(kk, k)
            win = x_ref[0, pl.ds(row_start + dy, th, s), pl.ds(dx, wo, s), :]
            acc = acc + win.astype(jnp.float32) * taps[kk]

    # Pointwise 1x1 conv == (th*wo, Cin) @ (Cin, Cout) on the MXU, f32 accumulation.
    lhs = acc.reshape(th * wo, cin).astype(compute_dtype)
    out = jnp.dot(lhs, pw_ref[...], preferred_element_type=jnp.float32)
    o_ref[...] = out[None].astype(o_ref.dtype)


def _largest_row_tile(ho, wo, target_m_rows):
    """Largest divisor of Ho such that the (th*wo, Cout) output block is layout-legal."""
    cap = max(1, min(ho, target_m_rows // max(1, wo)))
    for th in range(cap, 0, -1):
        if ho % th == 0 and ((th * wo) % 8 == 0 or th == ho):
            return th
    return ho   # full-height fallback is always legal (block == full array dims)


# ---------------------------------------------------------------------------
# Wrapper (PyTorch-layout weights / NCHW activations)
# ---------------------------------------------------------------------------

def depthwise_separable_conv2d(x_nchw, depthwise_weight, pointwise_weight, *,
                               stride=1, padding=1,
                               compute_dtype=jnp.bfloat16, target_m_rows=128):
    """Forward pass of DepthwiseSeparableConv2d.

    x_nchw:            (B, Cin, H, W)     float32
    depthwise_weight:  (Cin, 1, k, k)     torch layout (groups=Cin, bias=False)
    pointwise_weight:  (Cout, Cin, 1, 1)  torch layout (bias=False)
    returns            (B, Cout, Ho, Wo)  float32
    """
    b, cin, h, w = x_nchw.shape
    k = depthwise_weight.shape[-1]
    assert depthwise_weight.shape == (cin, 1, k, k), depthwise_weight.shape
    cout = pointwise_weight.shape[0]
    assert pointwise_weight.shape == (cout, cin, 1, 1), pointwise_weight.shape
    s, p = stride, padding

    ho = (h + 2 * p - k) // s + 1
    wo = (w + 2 * p - k) // s + 1
    hp, wp = h + 2 * p, w + 2 * p

    # NCHW -> NHWC (+ zero pad) so channels sit on the 128-lane axis.
    x = jnp.transpose(x_nchw, (0, 2, 3, 1))
    x = jnp.pad(x, ((0, 0), (p, p), (p, p), (0, 0)))

    # Depthwise taps as (k*k, Cin); pointwise as (Cin, Cout), pre-cast for the MXU.
    dw_taps = jnp.transpose(depthwise_weight[:, 0], (1, 2, 0)).reshape(k * k, cin)
    pw_mat = jnp.transpose(pointwise_weight[:, :, 0, 0], (1, 0)).astype(compute_dtype)

    th = _largest_row_tile(ho, wo, target_m_rows)
    grid = (b, ho // th)

    kernel = functools.partial(
        _dsc_fused_kernel, kernel_size=k, stride=s, block_rows=th, out_w=wo,
        compute_dtype=compute_dtype)

    out_flat = pl.pallas_call(
        kernel,
        out_shape=jax.ShapeDtypeStruct((b, ho * wo, cout), x_nchw.dtype),
        grid=grid,
        in_specs=[
            # Whole padded image per batch index; index_map is row-tile-invariant so
            # the block is DMA'd once per image and stays resident across tiles.
            pl.BlockSpec((1, hp, wp, cin), lambda bi, ti: (bi, 0, 0, 0)),
            pl.BlockSpec((k * k, cin), lambda bi, ti: (0, 0)),
            pl.BlockSpec((cin, cout), lambda bi, ti: (0, 0)),
        ],
        out_specs=pl.BlockSpec((1, th * wo, cout), lambda bi, ti: (bi, ti, 0)),
        compiler_params=pltpu.CompilerParams(
            dimension_semantics=("parallel", "parallel")),
    )(x, dw_taps, pw_mat)

    # (B, Ho*Wo, Cout) -> (B, Cout, Ho, Wo) to match the PyTorch output layout.
    out = out_flat.reshape(b, ho, wo, cout)
    return jnp.transpose(out, (0, 3, 1, 2))


# ---------------------------------------------------------------------------
# Pure-XLA reference (same math as the PyTorch module) for validation
# ---------------------------------------------------------------------------

def _reference_dsc(x_nchw, depthwise_weight, pointwise_weight, stride, padding):
    cin = x_nchw.shape[1]
    dn = ('NCHW', 'OIHW', 'NCHW')
    out = jax.lax.conv_general_dilated(
        x_nchw, depthwise_weight, (stride, stride), [(padding, padding)] * 2,
        dimension_numbers=dn, feature_group_count=cin)
    out = jax.lax.conv_general_dilated(
        out, pointwise_weight, (1, 1), [(0, 0)] * 2, dimension_numbers=dn)
    return out


if __name__ == "__main__":
    key = jax.random.PRNGKey(0)
    kx, kd, kp = jax.random.split(key, 3)

    B, Cin, H, W = 2, 4, 16, 16
    Cout = 8
    x = jax.random.normal(kx, (B, Cin, H, W), jnp.float32)
    dw_w = jax.random.normal(kd, (Cin, 1, 3, 3), jnp.float32) / 3.0
    pw_w = jax.random.normal(kp, (Cout, Cin, 1, 1), jnp.float32) / jnp.sqrt(float(Cin))

    out = depthwise_separable_conv2d(x, dw_w, pw_w, stride=1, padding=1)
    out = jax.block_until_ready(out)
    assert out.shape == (B, Cout, H, W), out.shape

    ref = _reference_dsc(x, dw_w, pw_w, 1, 1)
    max_err = float(jnp.max(jnp.abs(out - ref)))
    assert bool(jnp.allclose(out, ref, rtol=3e-2, atol=3e-2)), \
        f"mismatch vs reference, max abs err = {max_err}"
    print("KERNEL_OK")
</pallas_src>

<mosaic_0001>
module attributes {stable_mosaic.version = 11 : i64} {
  func.func @_dsc_fused_kernel(%arg0: i32, %arg1: i32, %arg2: memref<1x18x18x4xf32, #tpu.memory_space<vmem>>, %arg3: memref<9x4xf32, #tpu.memory_space<vmem>>, %arg4: memref<4x8xbf16, #tpu.memory_space<vmem>>, %arg5: memref<1x128x8xf32, #tpu.memory_space<vmem>>) attributes {dimension_semantics = [#tpu.dimension_semantics<parallel>, #tpu.dimension_semantics<parallel>], iteration_bounds = array<i64: 2, 2>, scalar_prefetch = 0 : i64, scratch_operands = 0 : i64, tpu.core_type = #tpu.core_type<tc>, window_params = [{transform_indices = @transform_0, window_bounds = array<i64: 1, 18, 18, 4>}, {pipeline_mode = #tpu.pipeline_mode<synchronous>, transform_indices = @transform_1, window_bounds = array<i64: 9, 4>}, {pipeline_mode = #tpu.pipeline_mode<synchronous>, transform_indices = @transform_2, window_bounds = array<i64: 4, 8>}, {transform_indices = @transform_3, window_bounds = array<i64: 1, 128, 8>}]} {
    %c8_i32 = arith.constant 8 : i32
    %0 = arith.muli %arg1, %c8_i32 : i32
    %c1_i32 = arith.constant 1 : i32
    %1 = arith.muli %0, %c1_i32 : i32
    %c0 = arith.constant 0 : index
    %c0_0 = arith.constant 0 : index
    %2 = vector.load %arg3[%c0, %c0_0] : memref<9x4xf32, #tpu.memory_space<vmem>>, vector<9x4xf32>
    %cst = arith.constant 0.000000e+00 : f32
    %3 = vector.broadcast %cst : f32 to vector<8x16x4xf32>
    %c0_1 = arith.constant 0 : index
    %4 = arith.index_cast %1 : i32 to index
    %c0_2 = arith.constant 0 : index
    %c0_3 = arith.constant 0 : index
    %5 = vector.load %arg2[%c0_1, %4, %c0_2, %c0_3] : memref<1x18x18x4xf32, #tpu.memory_space<vmem>>, vector<1x10x18x4xf32>
    %6 = vector.shape_cast %5 : vector<1x10x18x4xf32> to vector<10x18x4xf32>
    %7 = vector.extract_strided_slice %6 {offsets = [0, 0, 0], sizes = [8, 16, 4], strides = [1, 1, 1]} : vector<10x18x4xf32> to vector<8x16x4xf32>
    %8 = vector.extract_strided_slice %2 {offsets = [0, 0], sizes = [1, 4], strides = [1, 1]} : vector<9x4xf32> to vector<1x4xf32>
    %9 = vector.shape_cast %8 : vector<1x4xf32> to vector<4xf32>
    %10 = vector.shape_cast %9 : vector<4xf32> to vector<1x1x4xf32>
    %11 = vector.broadcast %10 : vector<1x1x4xf32> to vector<8x16x4xf32>
    %12 = arith.mulf %7, %11 : vector<8x16x4xf32>
    %13 = arith.addf %3, %12 : vector<8x16x4xf32>
    %14 = vector.extract_strided_slice %6 {offsets = [0, 1, 0], sizes = [8, 16, 4], strides = [1, 1, 1]} : vector<10x18x4xf32> to vector<8x16x4xf32>
    %15 = vector.extract_strided_slice %2 {offsets = [1, 0], sizes = [1, 4], strides = [1, 1]} : vector<9x4xf32> to vector<1x4xf32>
    %16 = vector.shape_cast %15 : vector<1x4xf32> to vector<4xf32>
    %17 = vector.shape_cast %16 : vector<4xf32> to vector<1x1x4xf32>
    %18 = vector.broadcast %17 : vector<1x1x4xf32> to vector<8x16x4xf32>
    %19 = arith.mulf %14, %18 : vector<8x16x4xf32>
    %20 = arith.addf %13, %19 : vector<8x16x4xf32>
    %21 = vector.extract_strided_slice %6 {offsets = [0, 2, 0], sizes = [8, 16, 4], strides = [1, 1, 1]} : vector<10x18x4xf32> to vector<8x16x4xf32>
    %22 = vector.extract_strided_slice %2 {offsets = [2, 0], sizes = [1, 4], strides = [1, 1]} : vector<9x4xf32> to vector<1x4xf32>
    %23 = vector.shape_cast %22 : vector<1x4xf32> to vector<4xf32>
    %24 = vector.shape_cast %23 : vector<4xf32> to vector<1x1x4xf32>
    %25 = vector.broadcast %24 : vector<1x1x4xf32> to vector<8x16x4xf32>
    %26 = arith.mulf %21, %25 : vector<8x16x4xf32>
    %27 = arith.addf %20, %26 : vector<8x16x4xf32>
    %28 = vector.extract_strided_slice %6 {offsets = [1, 0, 0], sizes = [8, 16, 4], strides = [1, 1, 1]} : vector<10x18x4xf32> to vector<8x16x4xf32>
    %29 = vector.extract_strided_slice %2 {offsets = [3, 0], sizes = [1, 4], strides = [1, 1]} : vector<9x4xf32> to vector<1x4xf32>
    %30 = vector.shape_cast %29 : vector<1x4xf32> to vector<4xf32>
    %31 = vector.shape_cast %30 : vector<4xf32> to vector<1x1x4xf32>
    %32 = vector.broadcast %31 : vector<1x1x4xf32> to vector<8x16x4xf32>
    %33 = arith.mulf %28, %32 : vector<8x16x4xf32>
    %34 = arith.addf %27, %33 : vector<8x16x4xf32>
    %35 = vector.extract_strided_slice %6 {offsets = [1, 1, 0], sizes = [8, 16, 4], strides = [1, 1, 1]} : vector<10x18x4xf32> to vector<8x16x4xf32>
    %36 = vector.extract_strided_slice %2 {offsets = [4, 0], sizes = [1, 4], strides = [1, 1]} : vector<9x4xf32> to vector<1x4xf32>
    %37 = vector.shape_cast %36 : vector<1x4xf32> to vector<4xf32>
    %38 = vector.shape_cast %37 : vector<4xf32> to vector<1x1x4xf32>
    %39 = vector.broadcast %38 : vector<1x1x4xf32> to vector<8x16x4xf32>
    %40 = arith.mulf %35, %39 : vector<8x16x4xf32>
    %41 = arith.addf %34, %40 : vector<8x16x4xf32>
    %42 = vector.extract_strided_slice %6 {offsets = [1, 2, 0], sizes = [8, 16, 4], strides = [1, 1, 1]} : vector<10x18x4xf32> to vector<8x16x4xf32>
    %43 = vector.extract_strided_slice %2 {offsets = [5, 0], sizes = [1, 4], strides = [1, 1]} : vector<9x4xf32> to vector<1x4xf32>
    %44 = vector.shape_cast %43 : vector<1x4xf32> to vector<4xf32>
    %45 = vector.shape_cast %44 : vector<4xf32> to vector<1x1x4xf32>
    %46 = vector.broadcast %45 : vector<1x1x4xf32> to vector<8x16x4xf32>
    %47 = arith.mulf %42, %46 : vector<8x16x4xf32>
    %48 = arith.addf %41, %47 : vector<8x16x4xf32>
    %49 = vector.extract_strided_slice %6 {offsets = [2, 0, 0], sizes = [8, 16, 4], strides = [1, 1, 1]} : vector<10x18x4xf32> to vector<8x16x4xf32>
    %50 = vector.extract_strided_slice %2 {offsets = [6, 0], sizes = [1, 4], strides = [1, 1]} : vector<9x4xf32> to vector<1x4xf32>
    %51 = vector.shape_cast %50 : vector<1x4xf32> to vector<4xf32>
    %52 = vector.shape_cast %51 : vector<4xf32> to vector<1x1x4xf32>
    %53 = vector.broadcast %52 : vector<1x1x4xf32> to vector<8x16x4xf32>
    %54 = arith.mulf %49, %53 : vector<8x16x4xf32>
    %55 = arith.addf %48, %54 : vector<8x16x4xf32>
    %56 = vector.extract_strided_slice %6 {offsets = [2, 1, 0], sizes = [8, 16, 4], strides = [1, 1, 1]} : vector<10x18x4xf32> to vector<8x16x4xf32>
    %57 = vector.extract_strided_slice %2 {offsets = [7, 0], sizes = [1, 4], strides = [1, 1]} : vector<9x4xf32> to vector<1x4xf32>
    %58 = vector.shape_cast %57 : vector<1x4xf32> to vector<4xf32>
    %59 = vector.shape_cast %58 : vector<4xf32> to vector<1x1x4xf32>
    %60 = vector.broadcast %59 : vector<1x1x4xf32> to vector<8x16x4xf32>
    %61 = arith.mulf %56, %60 : vector<8x16x4xf32>
    %62 = arith.addf %55, %61 : vector<8x16x4xf32>
    %63 = vector.extract_strided_slice %6 {offsets = [2, 2, 0], sizes = [8, 16, 4], strides = [1, 1, 1]} : vector<10x18x4xf32> to vector<8x16x4xf32>
    %64 = vector.extract_strided_slice %2 {offsets = [8, 0], sizes = [1, 4], strides = [1, 1]} : vector<9x4xf32> to vector<1x4xf32>
    %65 = vector.shape_cast %64 : vector<1x4xf32> to vector<4xf32>
    %66 = vector.shape_cast %65 : vector<4xf32> to vector<1x1x4xf32>
    %67 = vector.broadcast %66 : vector<1x1x4xf32> to vector<8x16x4xf32>
    %68 = arith.mulf %63, %67 : vector<8x16x4xf32>
    %69 = arith.addf %62, %68 : vector<8x16x4xf32>
    %70 = vector.shape_cast %69 : vector<8x16x4xf32> to vector<128x4xf32>
    %71 = arith.truncf %70 : vector<128x4xf32> to vector<128x4xbf16>
    %c0_4 = arith.constant 0 : index
    %c0_5 = arith.constant 0 : index
    %72 = vector.load %arg4[%c0_4, %c0_5] : memref<4x8xbf16, #tpu.memory_space<vmem>>, vector<4x8xbf16>
    %cst_6 = arith.constant dense<0.000000e+00> : vector<128x8xf32>
    %73 = tpu.matmul %71, %72, %cst_6 {dimension_numbers = #tpu.dot_dimension_numbers<[1], [0], [0], [1], [0, 0, 1, 1], [], []>} : vector<128x4xbf16>, vector<4x8xbf16>, vector<128x8xf32> -> vector<128x8xf32>
    %74 = vector.shape_cast %73 : vector<128x8xf32> to vector<1x128x8xf32>
    %c0_7 = arith.constant 0 : index
    %c0_8 = arith.constant 0 : index
    %c0_9 = arith.constant 0 : index
    %75 = vector.load %arg5[%c0_7, %c0_8, %c0_9] : memref<1x128x8xf32, #tpu.memory_space<vmem>>, vector<1x128x8xf32>
    tpu.vector_store %arg5[%c0_7, %c0_8, %c0_9], %74 {strides = array<i32>} : memref<1x128x8xf32, #tpu.memory_space<vmem>>, vector<1x128x8xf32>,
    return
  }
  func.func @transform_0(%arg0: i32, %arg1: i32) -> (i32, i32, i32, i32) {
    %c0_i32 = arith.constant 0 : i32
    %c0_i32_0 = arith.constant 0 : i32
    %c0_i32_1 = arith.constant 0 : i32
    %c0_i32_2 = arith.constant 0 : i32
    return %arg0, %c0_i32, %c0_i32_0, %c0_i32_1 : i32, i32, i32, i32
  }
  func.func @transform_1(%arg0: i32, %arg1: i32) -> (i32, i32) {
    %c0_i32 = arith.constant 0 : i32
    %c0_i32_0 = arith.constant 0 : i32
    %c0_i32_1 = arith.constant 0 : i32
    return %c0_i32, %c0_i32_0 : i32, i32
  }
  func.func @transform_2(%arg0: i32, %arg1: i32) -> (i32, i32) {
    %c0_i32 = arith.constant 0 : i32
    %c0_i32_0 = arith.constant 0 : i32
    %c0_i32_1 = arith.constant 0 : i32
    return %c0_i32, %c0_i32_0 : i32, i32
  }
  func.func @transform_3(%arg0: i32, %arg1: i32) -> (i32, i32, i32) {
    %c0_i32 = arith.constant 0 : i32
    %c0_i32_0 = arith.constant 0 : i32
    return %arg0, %arg1, %c0_i32 : i32, i32, i32
  }
}

</mosaic_0001>

<bundles_post_ra>
// kernel: tpu_custom_call.1
= control target key start
LH: loop header
LB: loop body
LE: loop exit
PB: predicated region body
PF: predicated region fallthrough
CT: control target
= control target key end

     0   :  { %s1477_s12 = smov 0   ;;  %s1479_s13 = smov 0   ;;  %s2163_s0 = inlined_call_operand.vmem [shape: f32[2,18,18,4], index: 0, kind: input, shape index: {}]   ;;  %s2164_s1 = inlined_call_operand.vmem [shape: f32[9,4], index: 1, kind: input, shape index: {}]   ;;  %s2165_s2 = inlined_call_operand.vmem [shape: bf16[4,8], index: 2, kind: input, shape index: {}]   ;;  %s2166_s3 = inlined_call_operand.vmem [shape: f32[2,256,8], index: 3, kind: output, shape index: {}]  }
   0x1   :  { %s1481_s14 = smov 0   ;;  %s1483_s15 = smov 0  }
   0x2   :  { %s1485_s16 = smov 0  }
   0x3 LB: > { %s22_s17 = sadd.s32 1, %s1447_s14  ;;  %s25_s18 = sadd.s32 1, %s1451_s15  ;;  %s1455_s16 = sphi %s1485_s16, %s13_s16   ;;  %s1451_s15 = sphi %s1483_s15, %s2170_s15   ;;  %s1447_s14 = sphi %s1481_s14, %s2169_s14   ;;  %s1443_s13 = sphi %s1479_s13, %s2168_s13   ;;  %s1439_s12 = sphi %s1477_s12, %s2167_s12  }
   0x4   : > { %p23_p0 = scmp.ge.s32.totalorder %s22_s17, 2  ;;  %p1326_p1 = scmp.ge.s32.totalorder %s1455_s16, 1 }
   0x5   : > { %p151_p2 = scmp.lt.s32.totalorder %s1455_s16, 5 }
   0x6   : > { %s2172_s17 = smov (%p23_p0, %s22_s17), 0  ;;  %s2174_s18 = smov (!%p23_p0, %s25_s18), %s1451_s15 }
   0x7   : > { %p152_p3 = pnand %p1326_p1, %p151_p2  ;;  %p27_p4 = scmp.ge.s32.totalorder %s2174_s18, 2 }
   0x8   : > { %v1092_v0 = vld [vmem:[%s2165_s2] sm:$0x3] (!%p152_p3)  ;;  %vm1118_vm0 = vcmask (!%p152_p3), 1041408   ;;  %p179_p5 = scmp.lt.s32.totalorder (!%p152_p3), %s1443_s13, 1  ;;  %v230_v1 = vlaneseq (!%p152_p3)  ;;  %s1332_s23 = smul.u32 (!%p152_p3), 192, %s1439_s12  ;;  %vm318_vm1 = vcmask (!%p152_p3), 1046528  }
   0x9   : > { %s2176_s18 = smov (%p27_p4, %s2174_s18), 0  ;;  %155 = sbr.rel (%p152_p3) target bundleno = 385 (0x181), region = 32 }
   0xa   : > { %1373 = vmatprep.subr.msk.bf16.mxu0 (!%p152_p3), %vm1118_vm0, %v1092_v0  ;;  %1374 = vmatprep.subr.msk.bf16.mxu1 (!%p152_p3), %vm1118_vm0, %v1092_v0  ;;  %v1120_v2 = vsel (!%p152_p3), %vm1118_vm0, %v1092_v0, 0  ;;  %v231_v3 = vshrl.u32 (!%p152_p3), %v230_v1, 7  ;;  %v196_v4 = vld [vmem:[%s2164_s1] sm:$0xff] (!%p152_p3)  ;;  %vm443_vm2 = vcmask (!%p152_p3), 1045504   ;;  %v1595_v0 = vld [vmem:[%s2164_s1 + $0x8] ss:$0 sm:$0xff] (!%p152_p3) }
   0xb   : > { %1354 = vmatpush3.bf16.msra.mxu0 (!%p152_p3), %v1120_v2  ;;  %1372 = vmatpush3.bf16.msra.mxu1 (!%p152_p3), %v1120_v2  ;;  %vm1093_vm3 = vcmask (!%p152_p3), 31744   ;;  %s1328_s6 = sshll.u32 (!%p152_p3), %s1439_s12, 4  ;;  %vm1219_vm4 = vcmask (!%p152_p3), 64512  }
   0xc   : > { %v232_v5 = vsub.s32 (!%p152_p3), 0, %v231_v3  ;;  %v268_v6 = vsub.s32 (!%p152_p3), 1, %v231_v3  ;;  %v393_v7 = vsub.s32 (!%p152_p3), 2, %v231_v3  ;;  %v518_v8 = vsub.s32 (!%p152_p3), 3, %v231_v3  ;;  %p187_p6 = scmp.lt.s32.totalorder (!%p152_p3), %s1328_s6, 31 }
   0xd   : > { %v554_v9 = vsub.s32 (!%p152_p3), 4, %v231_v3  ;;  %v678_v10 = vsub.s32 (!%p152_p3), 5, %v231_v3  ;;  %v802_v11 = vsub.s32 (!%p152_p3), 6, %v231_v3  ;;  %v838_v12 = vsub.s32 (!%p152_p3), 7, %v231_v3 }
   0xe   : > { %v1522_v13 = vrot.slane (!%p152_p3), %v196_v4, %v232_v5  ;;  %v1524_v14 = vrot.slane (!%p152_p3), %v196_v4, %v268_v6  ;;  %v1526_v15 = vrot.slane (!%p152_p3), %v196_v4, %v393_v7  ;;  %v1530_v16 = vrot.slane (!%p152_p3), %v196_v4, %v518_v8 }
   0xf   : > { %v1535_v20 = vrot.slane (!%p152_p3), %v196_v4, %v554_v9  ;;  %v1537_v21 = vrot.slane (!%p152_p3), %v196_v4, %v678_v10  ;;  %v1539_v22 = vrot.slane (!%p152_p3), %v196_v4, %v802_v11  ;;  %v1541_v23 = vrot.slane (!%p152_p3), %v196_v4, %v838_v12 }
  0x10   : > { %s2178_s13 = smov (!%p179_p5, %s1443_s13), 1  ;;  %s2180_s6 = smov (!%p187_p6, %s1328_s6), 31 }
  0x11   : > { %s1375_s24 = smul.u32 432, %s2178_s13  ;;  %s1329_s7 = sshll.u32 %s2178_s13, 5 }
  0x12   : > { %s190_s8 = sadd.s32 %s1329_s7, %s2180_s6 }
  0x13   : > { %s183_s27 = scalar_lea.vmem %s2163_s0, %s1375_s24  ;;  %s1330_s9 = sshll.u32 %s190_s8, 3 }
  0x14   : > { %s1528_s28 = scalar_lea.vmem %s183_s27, %s1332_s23  ;;  %s2114_s19 = scalar_lea.vmem %s2166_s3, %s1330_s9 }
  0x15   : > { %v200_v17 = vld [vmem:[%s1528_s28] sm:$0xff]  ;;  %v201_v18 = vld [vmem:[%s1528_s28 + $0x8] sm:$0xff]  ;;  %v202_v19 = vld [vmem:[%s1528_s28 + $0x10] sm:$0x3] }
  0x16   : > { %v205_v24 = vld [vmem:[%s1528_s28 + $0x28] sm:$0x3]  ;;  %v234_v25 = vmul.f32 %v1522_v13, %v200_v17  ;;  %v235_v26 = vmul.f32 %v1522_v13, %v201_v18  ;;  %v270_v27 = vmul.f32 %v1524_v14, %v200_v17  ;;  %v271_v28 = vmul.f32 %v1524_v14, %v201_v18  ;;  %v1549_v29 = vld [vmem:[%s1528_s28 + $0x40] sm:$0x3]  ;;  %v1567_v42 = vld [vmem:[%s1528_s28 + $0x18] sm:$0xff] }
  0x17   : > { %v272_v30 = vmul.f32 %v1524_v14, %v202_v19  ;;  %v1553_v31 = vmul.f32 %v1524_v14, %v205_v24  ;;  %v395_v32 = vmul.f32 %v1526_v15, %v200_v17  ;;  %v396_v33 = vmul.f32 %v1526_v15, %v201_v18  ;;  %v1572_v47 = vld [vmem:[%s1528_s28 + $0x20] sm:$0xff]  ;;  %v1598_v5 = vld [vmem:[%s1528_s28 + $0x30] sm:$0xff]  ;;  %v1601_v6 = vld [vmem:[%s1528_s28 + $0x38] sm:$0xff] }
  0x18   : > { %v1559_v34 = vmul.f32 %v1524_v14, %v1549_v29  ;;  %v319_v35 = vrot.slane %v270_v27, 1  ;;  %v320_v36 = vrot.slane %v271_v28, 1  ;;  %v397_v37 = vmul.f32 %v1526_v15, %v202_v19 }
  0x19   : > { %v322_v38 = vrot.slane %v272_v30, 1  ;;  %v327_v39 = vrot.slane %v1553_v31, 1  ;;  %v1564_v40 = vmul.f32 %v1526_v15, %v205_v24  ;;  %v444_v41 = vrot.slane %v395_v32, 2 }
  0x1a   : > { %v321_v43 = vsel %vm318_vm1, %v319_v35, %v320_v36  ;;  %v332_v44 = vrot.slane %v1559_v34, 1  ;;  %v445_v45 = vrot.slane %v396_v33, 2  ;;  %v447_v46 = vrot.slane %v397_v37, 2 }
  0x1b   : > { %v323_v48 = vsel %vm318_vm1, %v320_v36, %v322_v38  ;;  %v375_v49 = vadd.f32 %v321_v43, %v234_v25  ;;  %v452_v50 = vrot.slane %v1564_v40, 2  ;;  %v520_v51 = vmul.f32 %v1530_v16, %v1567_v42  ;;  %v1761_v40 = vld [vmem:[%s1528_s28 + $0x50] sm:$0xff] }
  0x1c   : > { %v376_v52 = vadd.f32 %v323_v48, %v235_v26  ;;  %v446_v53 = vsel %vm443_vm2, %v444_v41, %v445_v45  ;;  %v448_v54 = vsel %vm443_vm2, %v445_v45, %v447_v46  ;;  %v521_v55 = vmul.f32 %v1530_v16, %v1572_v47  ;;  %v1624_v46 = vld [vmem:[%s1528_s28 + $0x60] sm:$0xff]  ;;  %v1627_v48 = vld [vmem:[%s1528_s28 + $0x68] sm:$0xff] }
  0x1d   : > { %v500_v56 = vadd.f32 %v446_v53, %v375_v49  ;;  %v556_v57 = vmul.f32 %v1535_v20, %v1567_v42  ;;  %v557_v58 = vmul.f32 %v1535_v20, %v1572_v47  ;;  %v558_v59 = vmul.f32 %v1535_v20, %v205_v24 }
  0x1e   : > { %v501_v60 = vadd.f32 %v448_v54, %v376_v52  ;;  %v680_v61 = vmul.f32 %v1537_v21, %v1567_v42  ;;  %v681_v62 = vmul.f32 %v1537_v21, %v1572_v47  ;;  %v682_v63 = vmul.f32 %v1537_v21, %v205_v24  ;;  %v1630_v54 = vld [vmem:[%s1528_s28 + $0x70] sm:$0x3] }
  0x1f   : > { %v536_v1 = vadd.f32 %v520_v51, %v500_v56  ;;  %v604_v2 = vrot.slane %v556_v57, 1  ;;  %v605_v3 = vrot.slane %v557_v58, 1  ;;  %v607_v4 = vrot.slane %v558_v59, 1 }
  0x20   : > { %v537_v7 = vadd.f32 %v521_v55, %v501_v60  ;;  %v728_v8 = vrot.slane %v680_v61, 2  ;;  %v729_v9 = vrot.slane %v681_v62, 2  ;;  %v731_v10 = vrot.slane %v682_v63, 2  ;;  %v1633_v55 = vld [vmem:[%s1528_s28 + $0xa0] sm:$0x3] }
  0x21   : > { %v606_v11 = vsel %vm318_vm1, %v604_v2, %v605_v3  ;;  %v608_v12 = vsel %vm318_vm1, %v605_v3, %v607_v4  ;;  %v804_v17 = vmul.f32 %v1539_v22, %v1598_v5  ;;  %v805_v18 = vmul.f32 %v1539_v22, %v1601_v6 }
  0x22   : > { %v660_v19 = vadd.f32 %v606_v11, %v536_v1  ;;  %v661_v24 = vadd.f32 %v608_v12, %v537_v7  ;;  %v730_v25 = vsel %vm443_vm2, %v728_v8, %v729_v9  ;;  %v732_v26 = vsel %vm443_vm2, %v729_v9, %v731_v10 }
  0x23   : > { %v840_v27 = vmul.f32 %v1541_v23, %v1598_v5  ;;  %v841_v28 = vmul.f32 %v1541_v23, %v1601_v6  ;;  %v842_v30 = vmul.f32 %v1541_v23, %v1549_v29  ;;  %v964_v32 = vmul.f32 %v1595_v0, %v1598_v5 }
  0x24   : > { %v784_v33 = vadd.f32 %v730_v25, %v660_v19  ;;  %v785_v35 = vadd.f32 %v732_v26, %v661_v24  ;;  %v965_v36 = vmul.f32 %v1595_v0, %v1601_v6  ;;  %v966_v37 = vmul.f32 %v1595_v0, %v1549_v29  ;;  %v1659_v24 = vld [vmem:[%s1528_s28 + $0x78] sm:$0xff]  ;;  %v1662_v25 = vld [vmem:[%s1528_s28 + $0x80] sm:$0xff] }
  0x25   : > { %v888_v38 = vrot.slane %v840_v27, 1  ;;  %v889_v41 = vrot.slane %v841_v28, 1  ;;  %v891_v43 = vrot.slane %v842_v30, 1  ;;  %v1012_v45 = vrot.slane %v964_v32, 2 }
  0x26   : > { %v820_v49 = vadd.f32 %v804_v17, %v784_v33  ;;  %v821_v51 = vadd.f32 %v805_v18, %v785_v35  ;;  %v1013_v52 = vrot.slane %v965_v36, 2  ;;  %v1015_v53 = vrot.slane %v966_v37, 2  ;;  %v1674_v36 = vld [vmem:[%s1528_s28 + $0x88] sm:$0x3] }
  0x27   : > { %v890_v56 = vsel %vm318_vm1, %v888_v38, %v889_v41  ;;  %v892_v57 = vsel %vm318_vm1, %v889_v41, %v891_v43  ;;  %v242_v58 = vmul.f32 %v1522_v13, %v1624_v46  ;;  %v243_v59 = vmul.f32 %v1522_v13, %v1627_v48 }
  0x28   : > { %v944_v60 = vadd.f32 %v890_v56, %v820_v49  ;;  %v945_v61 = vadd.f32 %v892_v57, %v821_v51  ;;  %v1014_v62 = vsel %vm443_vm2, %v1012_v45, %v1013_v52  ;;  %v1016_v63 = vsel %vm443_vm2, %v1013_v52, %v1015_v53 }
  0x29   : > { %v282_v1 = vmul.f32 %v1524_v14, %v1624_v46  ;;  %v283_v2 = vmul.f32 %v1524_v14, %v1627_v48  ;;  %v284_v3 = vmul.f32 %v1524_v14, %v1630_v54  ;;  %v1651_v4 = vmul.f32 %v1524_v14, %v1633_v55 }
  0x2a   : > { %v1068_v7 = vadd.f32 %v1014_v62, %v944_v60  ;;  %v1069_v8 = vadd.f32 %v1016_v63, %v945_v61  ;;  %v407_v9 = vmul.f32 %v1526_v15, %v1624_v46  ;;  %v408_v10 = vmul.f32 %v1526_v15, %v1627_v48  ;;  %v1691_v63 = vld [vmem:[%s1528_s28 + $0x90] sm:$0xff] }
  0x2b   : > { %v339_v11 = vrot.slane %v282_v1, 1  ;;  %v340_v12 = vrot.slane %v283_v2, 1  ;;  %v342_v17 = vrot.slane %v284_v3, 1  ;;  %v352_v18 = vrot.slane %v1651_v4, 1 }
  0x2c   : > { %v1084_v19 = vpack.c.bf16 %v1069_v8, %v1068_v7  ;;  %v409_v26 = vmul.f32 %v1526_v15, %v1630_v54  ;;  %v464_v27 = vrot.slane %v407_v9, 2  ;;  %v465_v28 = vrot.slane %v408_v10, 2  ;;  %v1694_v8 = vld [vmem:[%s1528_s28 + $0x98] sm:$0xff] }
  0x2d   : > { %v341_v30 = vsel %vm318_vm1, %v339_v11, %v340_v12  ;;  %v343_v32 = vsel %vm318_vm1, %v340_v12, %v342_v17  ;;  %v528_v33 = vmul.f32 %v1530_v16, %v1659_v24  ;;  %v529_v35 = vmul.f32 %v1530_v16, %v1662_v25 }
  0x2e   : > { %1355 = vmatprep.mubr.msk.bf16.mxu0 %vm1093_vm3, %v1084_v19  ;;  %v383_v37 = vadd.f32 %v341_v30, %v242_v58  ;;  %v384_v38 = vadd.f32 %v343_v32, %v243_v59  ;;  %v466_v41 = vsel %vm443_vm2, %v464_v27, %v465_v28  ;;  %v467_v43 = vrot.slane %v409_v26, 2 }
  0x2f   : > { %v568_v45 = vmul.f32 %v1535_v20, %v1659_v24  ;;  %v569_v49 = vmul.f32 %v1535_v20, %v1662_v25  ;;  %v570_v51 = vmul.f32 %v1535_v20, %v1674_v36  ;;  %v692_v52 = vmul.f32 %v1537_v21, %v1659_v24 }
  0x30   : > { %v468_v53 = vsel %vm443_vm2, %v465_v28, %v467_v43  ;;  %v508_v56 = vadd.f32 %v466_v41, %v383_v37  ;;  %v693_v57 = vmul.f32 %v1537_v21, %v1662_v25  ;;  %v694_v58 = vmul.f32 %v1537_v21, %v1674_v36 }
  0x31   : > { %v509_v59 = vadd.f32 %v468_v53, %v384_v38  ;;  %v624_v60 = vrot.slane %v568_v45, 1  ;;  %v625_v61 = vrot.slane %v569_v49, 1  ;;  %v627_v62 = vrot.slane %v570_v51, 1 }
  0x32   : > { %v544_v1 = vadd.f32 %v528_v33, %v508_v56  ;;  %v748_v2 = vrot.slane %v692_v52, 2  ;;  %v749_v3 = vrot.slane %v693_v57, 2  ;;  %v751_v7 = vrot.slane %v694_v58, 2 }
  0x33   : > { %v545_v9 = vadd.f32 %v529_v35, %v509_v59  ;;  %v626_v10 = vsel %vm318_vm1, %v624_v60, %v625_v61  ;;  %v628_v11 = vsel %vm318_vm1, %v625_v61, %v627_v62  ;;  %v812_v12 = vmul.f32 %v1539_v22, %v1691_v63 }
  0x34   : > { %v668_v17 = vadd.f32 %v626_v10, %v544_v1  ;;  %v750_v19 = vsel %vm443_vm2, %v748_v2, %v749_v3  ;;  %v752_v26 = vsel %vm443_vm2, %v749_v3, %v751_v7  ;;  %v813_v27 = vmul.f32 %v1539_v22, %v1694_v8 }
  0x35   : > { %v669_v28 = vadd.f32 %v628_v11, %v545_v9  ;;  %v852_v30 = vmul.f32 %v1541_v23, %v1691_v63  ;;  %v853_v32 = vmul.f32 %v1541_v23, %v1694_v8  ;;  %v854_v33 = vmul.f32 %v1541_v23, %v1633_v55 }
  0x36   : > { %v792_v35 = vadd.f32 %v750_v19, %v668_v17  ;;  %v976_v37 = vmul.f32 %v1595_v0, %v1691_v63  ;;  %v977_v38 = vmul.f32 %v1595_v0, %v1694_v8  ;;  %v978_v41 = vmul.f32 %v1595_v0, %v1633_v55 }
  0x37   : > { %v793_v43 = vadd.f32 %v752_v26, %v669_v28  ;;  %v908_v45 = vrot.slane %v852_v30, 1  ;;  %v909_v49 = vrot.slane %v853_v32, 1  ;;  %v911_v51 = vrot.slane %v854_v33, 1 }
  0x38   : > { %v828_v52 = vadd.f32 %v812_v12, %v792_v35  ;;  %v1032_v53 = vrot.slane %v976_v37, 2  ;;  %v1033_v56 = vrot.slane %v977_v38, 2  ;;  %v1035_v57 = vrot.slane %v978_v41, 2 }
  0x39   : > { %v829_v58 = vadd.f32 %v813_v27, %v793_v43  ;;  %v910_v59 = vsel %vm318_vm1, %v908_v45, %v909_v49  ;;  %v912_v60 = vsel %vm318_vm1, %v909_v49, %v911_v51  ;;  %v236_v61 = vmul.f32 %v1522_v13, %v1567_v42 }
  0x3a   : > { %v952_v62 = vadd.f32 %v910_v59, %v828_v52  ;;  %v1034_v1 = vsel %vm443_vm2, %v1032_v53, %v1033_v56  ;;  %v1036_v2 = vsel %vm443_vm2, %v1033_v56, %v1035_v57  ;;  %v237_v3 = vmul.f32 %v1522_v13, %v1572_v47  ;;  %v1756_v57 = vld [vmem:[%s1528_s28 + $0x48] sm:$0xff] }
  0x3b   : > { %v953_v7 = vadd.f32 %v912_v60, %v829_v58  ;;  %v273_v9 = vmul.f32 %v1524_v14, %v1567_v42  ;;  %v274_v10 = vmul.f32 %v1524_v14, %v1572_v47  ;;  %v398_v11 = vmul.f32 %v1526_v15, %v1567_v42 }
  0x3c   : > { %v1076_v12 = vadd.f32 %v1034_v1, %v952_v62  ;;  %v399_v17 = vmul.f32 %v1526_v15, %v1572_v47  ;;  %v522_v19 = vmul.f32 %v1530_v16, %v1598_v5  ;;  %v523_v26 = vmul.f32 %v1530_v16, %v1601_v6 }
  0x3d   : > { %v1077_v27 = vadd.f32 %v1036_v2, %v953_v7  ;;  %v324_v28 = vrot.slane %v273_v9, 1  ;;  %v325_v30 = vrot.slane %v274_v10, 1  ;;  %v449_v32 = vrot.slane %v398_v11, 2 }
  0x3e   : > { %v450_v33 = vrot.slane %v399_v17, 2  ;;  %v559_v35 = vmul.f32 %v1535_v20, %v1598_v5  ;;  %v560_v42 = vmul.f32 %v1535_v20, %v1601_v6  ;;  %v561_v47 = vmul.f32 %v1535_v20, %v1549_v29 }
  0x3f   : > { %v1088_v37 = vpack.c.bf16 %v1077_v27, %v1076_v12  ;;  %v326_v38 = vsel %vm318_vm1, %v324_v28, %v325_v30  ;;  %v328_v41 = vsel %vm318_vm1, %v325_v30, %v327_v39  ;;  %v683_v43 = vmul.f32 %v1537_v21, %v1598_v5 }
  0x40   : > { %v377_v45 = vadd.f32 %v326_v38, %v236_v61  ;;  %v378_v49 = vadd.f32 %v328_v41, %v237_v3  ;;  %v451_v51 = vsel %vm443_vm2, %v449_v32, %v450_v33  ;;  %v453_v52 = vsel %vm443_vm2, %v450_v33, %v452_v50  ;;  %v1768_v3 = vld [vmem:[%s1528_s28 + $0x58] sm:$0x3] }
  0x41   : > { %1363 = vmatprep.mubr.msk.bf16.mxu1 %vm1093_vm3, %v1088_v37  ;;  %v609_v53 = vrot.slane %v559_v35, 1  ;;  %v610_v56 = vrot.slane %v560_v42, 1  ;;  %v612_v31 = vrot.slane %v561_v47, 1  ;;  %v684_v39 = vmul.f32 %v1537_v21, %v1601_v6 }
  0x42   : > { %v502_v58 = vadd.f32 %v451_v51, %v377_v45  ;;  %v503_v59 = vadd.f32 %v453_v52, %v378_v49  ;;  %v685_v60 = vmul.f32 %v1537_v21, %v1549_v29  ;;  %v733_v61 = vrot.slane %v683_v43, 2 }
  0x43   : > { %v611_v50 = vsel %vm318_vm1, %v609_v53, %v610_v56  ;;  %v613_v62 = vsel %vm318_vm1, %v610_v56, %v612_v31  ;;  %v734_v1 = vrot.slane %v684_v39, 2  ;;  %v806_v2 = vmul.f32 %v1539_v22, %v1756_v57 }
  0x44   : > { %v538_v7 = vadd.f32 %v522_v19, %v502_v58  ;;  %v539_v9 = vadd.f32 %v523_v26, %v503_v59  ;;  %v736_v10 = vrot.slane %v685_v60, 2  ;;  %v807_v11 = vmul.f32 %v1539_v22, %v1761_v40 }
  0x45   : > { %v735_v12 = vsel %vm443_vm2, %v733_v61, %v734_v1  ;;  %v843_v17 = vmul.f32 %v1541_v23, %v1756_v57  ;;  %v844_v27 = vmul.f32 %v1541_v23, %v1761_v40  ;;  %v845_v28 = vmul.f32 %v1541_v23, %v1768_v3 }
  0x46   : > { %v662_v30 = vadd.f32 %v611_v50, %v538_v7  ;;  %v663_v32 = vadd.f32 %v613_v62, %v539_v9  ;;  %v737_v19 = vsel %vm443_vm2, %v734_v1, %v736_v10  ;;  %v967_v26 = vmul.f32 %v1595_v0, %v1756_v57 }
  0x47   : > { %v893_v33 = vrot.slane %v843_v17, 1  ;;  %v894_v35 = vrot.slane %v844_v27, 1  ;;  %v896_v42 = vrot.slane %v845_v28, 1  ;;  %v968_v47 = vmul.f32 %v1595_v0, %v1761_v40 }
  0x48   : > { %v786_v37 = vadd.f32 %v735_v12, %v662_v30  ;;  %v787_v38 = vadd.f32 %v737_v19, %v663_v32  ;;  %v969_v41 = vmul.f32 %v1595_v0, %v1768_v3  ;;  %v1017_v43 = vrot.slane %v967_v26, 2 }
  0x49   : > { %v895_v45 = vsel %vm318_vm1, %v893_v33, %v894_v35  ;;  %v897_v49 = vsel %vm318_vm1, %v894_v35, %v896_v42  ;;  %v1018_v51 = vrot.slane %v968_v47, 2  ;;  %v244_v52 = vmul.f32 %v1522_v13, %v1659_v24 }
  0x4a   : > { %v822_v53 = vadd.f32 %v806_v2, %v786_v37  ;;  %v823_v56 = vadd.f32 %v807_v11, %v787_v38  ;;  %v1020_v31 = vrot.slane %v969_v41, 2  ;;  %v245_v39 = vmul.f32 %v1522_v13, %v1662_v25 }
  0x4b   : > { %v1019_v58 = vsel %vm443_vm2, %v1017_v43, %v1018_v51  ;;  %v285_v59 = vmul.f32 %v1524_v14, %v1659_v24  ;;  %v286_v60 = vmul.f32 %v1524_v14, %v1662_v25  ;;  %v287_v61 = vmul.f32 %v1524_v14, %v1674_v36 }
  0x4c   : > { %v946_v50 = vadd.f32 %v895_v45, %v822_v53  ;;  %v947_v62 = vadd.f32 %v897_v49, %v823_v56  ;;  %v1021_v1 = vsel %vm443_vm2, %v1018_v51, %v1020_v31  ;;  %v410_v2 = vmul.f32 %v1526_v15, %v1659_v24 }
  0x4d   : > { %v344_v7 = vrot.slane %v285_v59, 1  ;;  %v345_v9 = vrot.slane %v286_v60, 1  ;;  %v347_v10 = vrot.slane %v287_v61, 1  ;;  %v411_v11 = vmul.f32 %v1526_v15, %v1662_v25 }
  0x4e   : > { %v1070_v12 = vadd.f32 %v1019_v58, %v946_v50  ;;  %v1071_v17 = vadd.f32 %v1021_v1, %v947_v62  ;;  %v412_v27 = vmul.f32 %v1526_v15, %v1674_v36  ;;  %v469_v28 = vrot.slane %v410_v2, 2  ;;  %v1826_v58 = vld [vmem:[%s1528_s28 + $0xa8] sm:$0xff]  ;;  %v1831_v62 = vld [vmem:[%s1528_s28 + $0xb0] sm:$0xff] }
  0x4f   : > { %v346_v30 = vsel %vm318_vm1, %v344_v7, %v345_v9  ;;  %v348_v32 = vsel %vm318_vm1, %v345_v9, %v347_v10  ;;  %v470_v19 = vrot.slane %v411_v11, 2  ;;  %v530_v26 = vmul.f32 %v1530_v16, %v1691_v63 }
  0x50   : > { %v1085_v33 = vpack.c.bf16 %v1071_v17, %v1070_v12  ;;  %v385_v35 = vadd.f32 %v346_v30, %v244_v52  ;;  %v386_v42 = vadd.f32 %v348_v32, %v245_v39  ;;  %v472_v47 = vrot.slane %v412_v27, 2  ;;  %v1840_v27 = vld [vmem:[%s1528_s28 + $0xb8] sm:$0x3] }
  0x51   : > { %v471_v37 = vsel %vm443_vm2, %v469_v28, %v470_v19  ;;  %v531_v38 = vmul.f32 %v1530_v16, %v1694_v8  ;;  %v571_v41 = vmul.f32 %v1535_v20, %v1691_v63  ;;  %v572_v43 = vmul.f32 %v1535_v20, %v1694_v8 }
  0x52   : > { %1356 = vmatmul.mubr.msk.bf16.vlgmr.msra.gmra.mrb[0].mxu0 %vm1093_vm3, %v1085_v33  ;;  %v473_v45 = vsel %vm443_vm2, %v470_v19, %v472_v47  ;;  %v510_v49 = vadd.f32 %v471_v37, %v385_v35  ;;  %v573_v51 = vmul.f32 %v1535_v20, %v1633_v55  ;;  %v695_v52 = vmul.f32 %v1537_v21, %v1691_v63 }
  0x53   : > { %v511_v53 = vadd.f32 %v473_v45, %v386_v42  ;;  %v629_v56 = vrot.slane %v571_v41, 1  ;;  %v630_v31 = vrot.slane %v572_v43, 1  ;;  %v696_v39 = vmul.f32 %v1537_v21, %v1694_v8 }
  0x54   : > { %v546_v59 = vadd.f32 %v530_v26, %v510_v49  ;;  %v632_v60 = vrot.slane %v573_v51, 1  ;;  %v697_v61 = vmul.f32 %v1537_v21, %v1633_v55  ;;  %v753_v50 = vrot.slane %v695_v52, 2 }
  0x55   : > { %v547_v1 = vadd.f32 %v531_v38, %v511_v53  ;;  %v631_v2 = vsel %vm318_vm1, %v629_v56, %v630_v31  ;;  %v754_v7 = vrot.slane %v696_v39, 2  ;;  %v814_v9 = vmul.f32 %v1539_v22, %v1826_v58 }
  0x56   : > { %v633_v10 = vsel %vm318_vm1, %v630_v31, %v632_v60  ;;  %v670_v11 = vadd.f32 %v631_v2, %v546_v59  ;;  %v756_v12 = vrot.slane %v697_v61, 2  ;;  %v815_v17 = vmul.f32 %v1539_v22, %v1831_v62 }
  0x57   : > { %v671_v28 = vadd.f32 %v633_v10, %v547_v1  ;;  %v755_v30 = vsel %vm443_vm2, %v753_v50, %v754_v7  ;;  %v855_v32 = vmul.f32 %v1541_v23, %v1826_v58  ;;  %v856_v19 = vmul.f32 %v1541_v23, %v1831_v62 }
  0x58   : > { %v757_v26 = vsel %vm443_vm2, %v754_v7, %v756_v12  ;;  %v794_v33 = vadd.f32 %v755_v30, %v670_v11  ;;  %v857_v35 = vmul.f32 %v1541_v23, %v1840_v27  ;;  %v979_v42 = vmul.f32 %v1595_v0, %v1826_v58 }
  0x59   : > { %v795_v47 = vadd.f32 %v757_v26, %v671_v28  ;;  %v913_v37 = vrot.slane %v855_v32, 1  ;;  %v914_v38 = vrot.slane %v856_v19, 1  ;;  %v980_v41 = vmul.f32 %v1595_v0, %v1831_v62 }
  0x5a   : > { %v830_v43 = vadd.f32 %v814_v9, %v794_v33  ;;  %v916_v45 = vrot.slane %v857_v35, 1  ;;  %v981_v49 = vmul.f32 %v1595_v0, %v1840_v27  ;;  %v1037_v51 = vrot.slane %v979_v42, 2 }
  0x5b   : > { %v831_v52 = vadd.f32 %v815_v17, %v795_v47  ;;  %v915_v53 = vsel %vm318_vm1, %v913_v37, %v914_v38  ;;  %v1038_v56 = vrot.slane %v980_v41, 2  ;;  %v238_v31 = vmul.f32 %v1522_v13, %v1598_v5 }
  0x5c   : > { %v917_v39 = vsel %vm318_vm1, %v914_v38, %v916_v45  ;;  %v954_v59 = vadd.f32 %v915_v53, %v830_v43  ;;  %v1040_v60 = vrot.slane %v981_v49, 2  ;;  %v239_v61 = vmul.f32 %v1522_v13, %v1601_v6 }
  0x5d   : > { %v955_v50 = vadd.f32 %v917_v39, %v831_v52  ;;  %v1039_v1 = vsel %vm443_vm2, %v1037_v51, %v1038_v56  ;;  %v276_v2 = vmul.f32 %v1524_v14, %v1598_v5  ;;  %v277_v7 = vmul.f32 %v1524_v14, %v1601_v6 }
  0x5e   : > { %v1041_v9 = vsel %vm443_vm2, %v1038_v56, %v1040_v60  ;;  %v1078_v10 = vadd.f32 %v1039_v1, %v954_v59  ;;  %v401_v11 = vmul.f32 %v1526_v15, %v1598_v5  ;;  %v402_v12 = vmul.f32 %v1526_v15, %v1601_v6 }
  0x5f   : > { %v1079_v17 = vadd.f32 %v1041_v9, %v955_v50  ;;  %v329_v28 = vrot.slane %v276_v2, 1  ;;  %v330_v30 = vrot.slane %v277_v7, 1  ;;  %v403_v32 = vmul.f32 %v1526_v15, %v1549_v29 }
  0x60   : > { %v454_v19 = vrot.slane %v401_v11, 2  ;;  %v455_v26 = vrot.slane %v402_v12, 2  ;;  %v524_v33 = vmul.f32 %v1530_v16, %v1756_v57  ;;  %v525_v35 = vmul.f32 %v1530_v16, %v1761_v40 }
  0x61   : > { %v1089_v42 = vpack.c.bf16 %v1079_v17, %v1078_v10  ;;  %v331_v5 = vsel %vm318_vm1, %v329_v28, %v330_v30  ;;  %v333_v6 = vsel %vm318_vm1, %v330_v30, %v332_v44  ;;  %v457_v47 = vrot.slane %v403_v32, 2 }
  0x62   : > { %v379_v37 = vadd.f32 %v331_v5, %v238_v31  ;;  %v380_v38 = vadd.f32 %v333_v6, %v239_v61  ;;  %v456_v29 = vsel %vm443_vm2, %v454_v19, %v455_v26  ;;  %v562_v41 = vmul.f32 %v1535_v20, %v1756_v57 }
  0x63   : > { %1364 = vmatmul.mubr.msk.bf16.vlgmr.msra.gmra.mrb[0].mxu1 %vm1093_vm3, %v1089_v42  ;;  %v458_v43 = vsel %vm443_vm2, %v455_v26, %v457_v47  ;;  %v563_v45 = vmul.f32 %v1535_v20, %v1761_v40  ;;  %v564_v34 = vmul.f32 %v1535_v20, %v1768_v3  ;;  %v686_v44 = vmul.f32 %v1537_v21, %v1756_v57 }
  0x64   : > { %v504_v49 = vadd.f32 %v456_v29, %v379_v37  ;;  %v505_v51 = vadd.f32 %v458_v43, %v380_v38  ;;  %v614_v52 = vrot.slane %v562_v41, 1  ;;  %v687_v53 = vmul.f32 %v1537_v21, %v1761_v40 }
  0x65   : > { %v615_v56 = vrot.slane %v563_v45, 1  ;;  %v617_v31 = vrot.slane %v564_v34, 1  ;;  %v688_v39 = vmul.f32 %v1537_v21, %v1768_v3  ;;  %v738_v59 = vrot.slane %v686_v44, 2 }
  0x66   : > { %v540_v60 = vadd.f32 %v524_v33, %v504_v49  ;;  %v541_v61 = vadd.f32 %v525_v35, %v505_v51  ;;  %v739_v50 = vrot.slane %v687_v53, 2  ;;  %v808_v1 = vmul.f32 %v1539_v22, %v1624_v46 }
  0x67   : > { %v616_v2 = vsel %vm318_vm1, %v614_v52, %v615_v56  ;;  %v618_v7 = vsel %vm318_vm1, %v615_v56, %v617_v31  ;;  %v741_v9 = vrot.slane %v688_v39, 2  ;;  %v809_v10 = vmul.f32 %v1539_v22, %v1627_v48 }
  0x68   : > { %v664_v11 = vadd.f32 %v616_v2, %v540_v60  ;;  %v665_v12 = vadd.f32 %v618_v7, %v541_v61  ;;  %v740_v17 = vsel %vm443_vm2, %v738_v59, %v739_v50  ;;  %v846_v28 = vmul.f32 %v1541_v23, %v1624_v46 }
  0x69   : > { %v742_v30 = vsel %vm443_vm2, %v739_v50, %v741_v9  ;;  %v847_v32 = vmul.f32 %v1541_v23, %v1627_v48  ;;  %v848_v19 = vmul.f32 %v1541_v23, %v1630_v54  ;;  %v970_v26 = vmul.f32 %v1595_v0, %v1624_v46 }
  0x6a   : > { %v788_v33 = vadd.f32 %v740_v17, %v664_v11  ;;  %v789_v35 = vadd.f32 %v742_v30, %v665_v12  ;;  %v898_v42 = vrot.slane %v846_v28, 1  ;;  %v971_v5 = vmul.f32 %v1595_v0, %v1627_v48 }
  0x6b   : > { %v899_v6 = vrot.slane %v847_v32, 1  ;;  %v901_v47 = vrot.slane %v848_v19, 1  ;;  %v972_v37 = vmul.f32 %v1595_v0, %v1630_v54  ;;  %v1022_v38 = vrot.slane %v970_v26, 2 }
  0x6c   : > { %v824_v29 = vadd.f32 %v808_v1, %v788_v33  ;;  %v825_v41 = vadd.f32 %v809_v10, %v789_v35  ;;  %v1023_v43 = vrot.slane %v971_v5, 2  ;;  %v246_v45 = vmul.f32 %v1522_v13, %v1691_v63 }
  0x6d   : > { %v900_v34 = vsel %vm318_vm1, %v898_v42, %v899_v6  ;;  %v902_v44 = vsel %vm318_vm1, %v899_v6, %v901_v47  ;;  %v1025_v49 = vrot.slane %v972_v37, 2  ;;  %v247_v51 = vmul.f32 %v1522_v13, %v1694_v8  ;;  %v1957_v47 = vld [vmem:[%s1528_s28 + $0xc0] sm:$0xff] }
  0x6e   : > { %v948_v52 = vadd.f32 %v900_v34, %v824_v29  ;;  %v949_v53 = vadd.f32 %v902_v44, %v825_v41  ;;  %v1024_v56 = vsel %vm443_vm2, %v1022_v38, %v1023_v43  ;;  %v288_v31 = vmul.f32 %v1524_v14, %v1691_v63 }
  0x6f   : > { %v1026_v39 = vsel %vm443_vm2, %v1023_v43, %v1025_v49  ;;  %v289_v59 = vmul.f32 %v1524_v14, %v1694_v8  ;;  %v413_v60 = vmul.f32 %v1526_v15, %v1691_v63  ;;  %v414_v61 = vmul.f32 %v1526_v15, %v1694_v8  ;;  %v1965_v49 = vld [vmem:[%s1528_s28 + $0xc8] sm:$0xff] }
  0x70   : > { %v1072_v50 = vadd.f32 %v1024_v56, %v948_v52  ;;  %v1073_v1 = vadd.f32 %v1026_v39, %v949_v53  ;;  %v349_v2 = vrot.slane %v288_v31, 1  ;;  %v415_v7 = vmul.f32 %v1526_v15, %v1633_v55  ;;  %v1969_v31 = vld [vmem:[%s1528_s28 + $0xd0] sm:$0x3] }
  0x71   : > { %v350_v9 = vrot.slane %v289_v59, 1  ;;  %v474_v10 = vrot.slane %v413_v60, 2  ;;  %v475_v11 = vrot.slane %v414_v61, 2  ;;  %v532_v12 = vmul.f32 %v1530_v16, %v1826_v58 }
  0x72   : > { %v1086_v17 = vpack.c.bf16 %v1073_v1, %v1072_v50  ;;  %v477_v28 = vrot.slane %v415_v7, 2  ;;  %v533_v63 = vmul.f32 %v1530_v16, %v1831_v62  ;;  %v574_v8 = vmul.f32 %v1535_v20, %v1826_v58 }
  0x73   : > { %v351_v30 = vsel %vm318_vm1, %v349_v2, %v350_v9  ;;  %v353_v55 = vsel %vm318_vm1, %v350_v9, %v352_v18  ;;  %v476_v32 = vsel %vm443_vm2, %v474_v10, %v475_v11  ;;  %v575_v19 = vmul.f32 %v1535_v20, %v1831_v62 }
  0x74   : > { %1359 = vmatprep.mubr.msk.bf16.mxu0 %vm1093_vm3, %v1086_v17  ;;  %v387_v26 = vadd.f32 %v351_v30, %v246_v45  ;;  %v388_v33 = vadd.f32 %v353_v55, %v247_v51  ;;  %v478_v35 = vsel %vm443_vm2, %v475_v11, %v477_v28  ;;  %v576_v42 = vmul.f32 %v1535_v20, %v1840_v27 }
  0x75   : > { %v634_v5 = vrot.slane %v574_v8, 1  ;;  %v635_v6 = vrot.slane %v575_v19, 1  ;;  %v698_v4 = vmul.f32 %v1537_v21, %v1826_v58  ;;  %v699_v18 = vmul.f32 %v1537_v21, %v1831_v62 }
  0x76   : > { %v512_v37 = vadd.f32 %v476_v32, %v387_v26  ;;  %v513_v38 = vadd.f32 %v478_v35, %v388_v33  ;;  %v637_v29 = vrot.slane %v576_v42, 1  ;;  %v700_v41 = vmul.f32 %v1537_v21, %v1840_v27 }
  0x77   : > { %v636_v43 = vsel %vm318_vm1, %v634_v5, %v635_v6  ;;  %v758_v45 = vrot.slane %v698_v4, 2  ;;  %v759_v34 = vrot.slane %v699_v18, 2  ;;  %v816_v44 = vmul.f32 %v1539_v22, %v1957_v47 }
  0x78   : > { %v548_v51 = vadd.f32 %v532_v12, %v512_v37  ;;  %v549_v52 = vadd.f32 %v533_v63, %v513_v38  ;;  %v638_v53 = vsel %vm318_vm1, %v635_v6, %v637_v29  ;;  %v761_v56 = vrot.slane %v700_v41, 2 }
  0x79   : > { %v760_v39 = vsel %vm443_vm2, %v758_v45, %v759_v34  ;;  %v817_v59 = vmul.f32 %v1539_v22, %v1965_v49  ;;  %v858_v60 = vmul.f32 %v1541_v23, %v1957_v47  ;;  %v859_v61 = vmul.f32 %v1541_v23, %v1965_v49 }
  0x7a   : > { %v672_v50 = vadd.f32 %v636_v43, %v548_v51  ;;  %v673_v1 = vadd.f32 %v638_v53, %v549_v52  ;;  %v762_v2 = vsel %vm443_vm2, %v759_v34, %v761_v56  ;;  %v860_v7 = vmul.f32 %v1541_v23, %v1969_v31 }
  0x7b   : > { %v918_v9 = vrot.slane %v858_v60, 1  ;;  %v919_v10 = vrot.slane %v859_v61, 1  ;;  %v982_v11 = vmul.f32 %v1595_v0, %v1957_v47  ;;  %v983_v12 = vmul.f32 %v1595_v0, %v1965_v49 }
  0x7c   : > { %v796_v17 = vadd.f32 %v760_v39, %v672_v50  ;;  %v797_v28 = vadd.f32 %v762_v2, %v673_v1  ;;  %v921_v63 = vrot.slane %v860_v7, 1  ;;  %v984_v8 = vmul.f32 %v1595_v0, %v1969_v31 }
  0x7d   : > { %v920_v30 = vsel %vm318_vm1, %v918_v9, %v919_v10  ;;  %v1042_v55 = vrot.slane %v982_v11, 2  ;;  %v1043_v32 = vrot.slane %v983_v12, 2  ;;  %v240_v19 = vmul.f32 %v1522_v13, %v1756_v57 }
  0x7e   : > { %v832_v26 = vadd.f32 %v816_v44, %v796_v17  ;;  %v833_v33 = vadd.f32 %v817_v59, %v797_v28  ;;  %v922_v35 = vsel %vm318_vm1, %v919_v10, %v921_v63  ;;  %v1045_v42 = vrot.slane %v984_v8, 2 }
  0x7f   : > { %v1044_v5 = vsel %vm443_vm2, %v1042_v55, %v1043_v32  ;;  %v241_v6 = vmul.f32 %v1522_v13, %v1761_v40  ;;  %v279_v4 = vmul.f32 %v1524_v14, %v1756_v57  ;;  %v280_v18 = vmul.f32 %v1524_v14, %v1761_v40 }
  0x80   : > { %v956_v37 = vadd.f32 %v920_v30, %v832_v26  ;;  %v957_v38 = vadd.f32 %v922_v35, %v833_v33  ;;  %v1046_v29 = vsel %vm443_vm2, %v1043_v32, %v1045_v42  ;;  %v281_v41 = vmul.f32 %v1524_v14, %v1768_v3 }
  0x81   : > { %v334_v43 = vrot.slane %v279_v4, 1  ;;  %v335_v45 = vrot.slane %v280_v18, 1  ;;  %v404_v34 = vmul.f32 %v1526_v15, %v1756_v57  ;;  %v405_v44 = vmul.f32 %v1526_v15, %v1761_v40 }
  0x82   : > { %v1080_v51 = vadd.f32 %v1044_v5, %v956_v37  ;;  %v1081_v52 = vadd.f32 %v1046_v29, %v957_v38  ;;  %v337_v53 = vrot.slane %v281_v41, 1  ;;  %v406_v56 = vmul.f32 %v1526_v15, %v1768_v3 }
  0x83   : > { %v336_v39 = vsel %vm318_vm1, %v334_v43, %v335_v45  ;;  %v459_v59 = vrot.slane %v404_v34, 2  ;;  %v460_v60 = vrot.slane %v405_v44, 2  ;;  %v526_v61 = vmul.f32 %v1530_v16, %v1624_v46 }
  0x84   : > { %v1090_v50 = vpack.c.bf16 %v1081_v52, %v1080_v51  ;;  %v338_v1 = vsel %vm318_vm1, %v335_v45, %v337_v53  ;;  %v381_v57 = vadd.f32 %v336_v39, %v240_v19  ;;  %v462_v2 = vrot.slane %v406_v56, 2 }
  0x85   : > { %v382_v7 = vadd.f32 %v338_v1, %v241_v6  ;;  %v461_v40 = vsel %vm443_vm2, %v459_v59, %v460_v60  ;;  %v527_v9 = vmul.f32 %v1530_v16, %v1627_v48  ;;  %v565_v3 = vmul.f32 %v1535_v20, %v1624_v46 }
  0x86   : > { %1367 = vmatprep.mubr.msk.bf16.mxu1 %vm1093_vm3, %v1090_v50  ;;  %v463_v10 = vsel %vm443_vm2, %v460_v60, %v462_v2  ;;  %v506_v11 = vadd.f32 %v461_v40, %v381_v57  ;;  %v566_v12 = vmul.f32 %v1535_v20, %v1627_v48  ;;  %v567_v17 = vmul.f32 %v1535_v20, %v1630_v54 }
  0x87   : > { %v507_v28 = vadd.f32 %v463_v10, %v382_v7  ;;  %v619_v63 = vrot.slane %v565_v3, 1  ;;  %v689_v8 = vmul.f32 %v1537_v21, %v1624_v46  ;;  %v690_v30 = vmul.f32 %v1537_v21, %v1627_v48 }
  0x88   : > { %v542_v55 = vadd.f32 %v526_v61, %v506_v11  ;;  %v620_v32 = vrot.slane %v566_v12, 1  ;;  %v622_v19 = vrot.slane %v567_v17, 1  ;;  %v691_v26 = vmul.f32 %v1537_v21, %v1630_v54 }
  0x89   : > { %v543_v33 = vadd.f32 %v527_v9, %v507_v28  ;;  %v743_v35 = vrot.slane %v689_v8, 2  ;;  %v744_v42 = vrot.slane %v690_v30, 2  ;;  %v810_v5 = vmul.f32 %v1539_v22, %v1659_v24 }
  0x8a   : > { %v621_v6 = vsel %vm318_vm1, %v619_v63, %v620_v32  ;;  %v623_v4 = vsel %vm318_vm1, %v620_v32, %v622_v19  ;;  %v746_v46 = vrot.slane %v691_v26, 2  ;;  %v811_v48 = vmul.f32 %v1539_v22, %v1662_v25 }
  0x8b   : > { %v666_v18 = vadd.f32 %v621_v6, %v542_v55  ;;  %v667_v37 = vadd.f32 %v623_v4, %v543_v33  ;;  %v745_v38 = vsel %vm443_vm2, %v743_v35, %v744_v42  ;;  %v849_v54 = vmul.f32 %v1541_v23, %v1659_v24 }
  0x8c   : > { %v747_v29 = vsel %vm443_vm2, %v744_v42, %v746_v46  ;;  %v850_v41 = vmul.f32 %v1541_v23, %v1662_v25  ;;  %v851_v43 = vmul.f32 %v1541_v23, %v1674_v36  ;;  %v973_v45 = vmul.f32 %v1595_v0, %v1659_v24 }
  0x8d   : > { %v790_v34 = vadd.f32 %v745_v38, %v666_v18  ;;  %v791_v44 = vadd.f32 %v747_v29, %v667_v37  ;;  %v903_v51 = vrot.slane %v849_v54, 1  ;;  %v974_v52 = vmul.f32 %v1595_v0, %v1662_v25  ;;  %v228_v18 = vld [vmem:[%s1528_s28 + $0xe0] sm:$0xff] }
  0x8e   : > { %v904_v53 = vrot.slane %v850_v41, 1  ;;  %v906_v56 = vrot.slane %v851_v43, 1  ;;  %v975_v39 = vmul.f32 %v1595_v0, %v1674_v36  ;;  %v1027_v59 = vrot.slane %v973_v45, 2 }
  0x8f   : > { %v826_v60 = vadd.f32 %v810_v5, %v790_v34  ;;  %v827_v61 = vadd.f32 %v811_v48, %v791_v44  ;;  %v1028_v50 = vrot.slane %v974_v52, 2  ;;  %v248_v1 = vmul.f32 %v1522_v13, %v1826_v58  ;;  %v229_v44 = vld [vmem:[%s1528_s28 + $0xe8] sm:$0x3] }
  0x90   : > { %v905_v24 = vsel %vm318_vm1, %v903_v51, %v904_v53  ;;  %v907_v57 = vsel %vm318_vm1, %v904_v53, %v906_v56  ;;  %v1030_v2 = vrot.slane %v975_v39, 2  ;;  %v249_v25 = vmul.f32 %v1522_v13, %v1831_v62 }
  0x91   : > { %v950_v7 = vadd.f32 %v905_v24, %v826_v60  ;;  %v951_v40 = vadd.f32 %v907_v57, %v827_v61  ;;  %v1029_v9 = vsel %vm443_vm2, %v1027_v59, %v1028_v50  ;;  %v291_v0 = vmul.f32 %v1524_v14, %v1826_v58  ;;  %v1416_v24 = vld [vmem:[%s2164_s1 + $0x8] ss:$0 sm:$0xff] }
  0x92   : > { %v1031_v36 = vsel %vm443_vm2, %v1028_v50, %v1030_v2  ;;  %v292_v3 = vmul.f32 %v1524_v14, %v1831_v62  ;;  %v293_v10 = vmul.f32 %v1524_v14, %v1840_v27  ;;  %v416_v11 = vmul.f32 %v1526_v15, %v1826_v58 }
  0x93   : > { %v1074_v12 = vadd.f32 %v1029_v9, %v950_v7  ;;  %v1075_v13 = vadd.f32 %v1031_v36, %v951_v40  ;;  %v354_v17 = vrot.slane %v291_v0, 1  ;;  %v417_v28 = vmul.f32 %v1526_v15, %v1831_v62 }
  0x94   : > { %v355_v63 = vrot.slane %v292_v3, 1  ;;  %v357_v8 = vrot.slane %v293_v10, 1  ;;  %v418_v30 = vmul.f32 %v1526_v15, %v1840_v27  ;;  %v479_v55 = vrot.slane %v416_v11, 2  ;;  %v227_v15 = vld [vmem:[%s1528_s28 + $0xd8] sm:$0xff] }
  0x95   : > { %v1087_v32 = vpack.c.bf16 %v1075_v13, %v1074_v12  ;;  %v480_v19 = vrot.slane %v417_v28, 2  ;;  %v534_v14 = vmul.f32 %v1530_v16, %v1957_v47  ;;  %v535_v58 = vmul.f32 %v1530_v16, %v1965_v49 }
  0x96   : > { %v356_v26 = vsel %vm318_vm1, %v354_v17, %v355_v63  ;;  %v358_v33 = vsel %vm318_vm1, %v355_v63, %v357_v8  ;;  %v482_v62 = vrot.slane %v418_v30, 2  ;;  %v577_v35 = vmul.f32 %v1535_v20, %v1957_v47 }
  0x97   : > { %1360 = vmatmul.mubr.msk.bf16.gmra.mrb[4].mxu0 %vm1093_vm3, %v1087_v32  ;;  %v389_v27 = vadd.f32 %v356_v26, %v248_v1  ;;  %v390_v42 = vadd.f32 %v358_v33, %v249_v25  ;;  %v481_v5 = vsel %vm443_vm2, %v479_v55, %v480_v19  ;;  %v578_v6 = vmul.f32 %v1535_v20, %v1965_v49 }
  0x98   : > { %v483_v16 = vsel %vm443_vm2, %v480_v19, %v482_v62  ;;  %v579_v4 = vmul.f32 %v1535_v20, %v1969_v31  ;;  %v639_v46 = vrot.slane %v577_v35, 1  ;;  %v701_v48 = vmul.f32 %v1537_v21, %v1957_v47 }
  0x99   : > { %v514_v37 = vadd.f32 %v481_v5, %v389_v27  ;;  %v515_v38 = vadd.f32 %v483_v16, %v390_v42  ;;  %v640_v54 = vrot.slane %v578_v6, 1  ;;  %v702_v29 = vmul.f32 %v1537_v21, %v1965_v49 }
  0x9a   : > { %v642_v41 = vrot.slane %v579_v4, 1  ;;  %v703_v43 = vmul.f32 %v1537_v21, %v1969_v31  ;;  %v763_v45 = vrot.slane %v701_v48, 2  ;;  %v818_v34 = vmul.f32 %v1539_v22, %v227_v15 }
  0x9b   : > { %v550_v20 = vadd.f32 %v534_v14, %v514_v37  ;;  %v551_v51 = vadd.f32 %v535_v58, %v515_v38  ;;  %v641_v52 = vsel %vm318_vm1, %v639_v46, %v640_v54  ;;  %v764_v47 = vrot.slane %v702_v29, 2 }
  0x9c   : > { %v643_v53 = vsel %vm318_vm1, %v640_v54, %v642_v41  ;;  %v766_v56 = vrot.slane %v703_v43, 2  ;;  %v819_v39 = vmul.f32 %v1539_v22, %v228_v18  ;;  %v861_v49 = vmul.f32 %v1541_v23, %v227_v15 }
  0x9d   : > { %v674_v59 = vadd.f32 %v641_v52, %v550_v20  ;;  %v675_v60 = vadd.f32 %v643_v53, %v551_v51  ;;  %v765_v21 = vsel %vm443_vm2, %v763_v45, %v764_v47  ;;  %v862_v31 = vmul.f32 %v1541_v23, %v228_v18 }
  0x9e   : > { %v767_v61 = vsel %vm443_vm2, %v764_v47, %v766_v56  ;;  %v863_v50 = vmul.f32 %v1541_v23, %v229_v44  ;;  %v923_v1 = vrot.slane %v861_v49, 1  ;;  %v985_v57 = vmul.f32 %v1416_v24, %v227_v15 }
  0x9f   : > { %v798_v2 = vadd.f32 %v765_v21, %v674_v59  ;;  %v799_v22 = vadd.f32 %v767_v61, %v675_v60  ;;  %v924_v25 = vrot.slane %v862_v31, 1  ;;  %v986_v7 = vmul.f32 %v1416_v24, %v228_v18 }
  0xa0   : > { %v926_v40 = vrot.slane %v863_v50, 1  ;;  %v987_v9 = vmul.f32 %v1416_v24, %v229_v44  ;;  %v1047_v0 = vrot.slane %v985_v57, 2 }
  0xa1   : > { %v834_v36 = vadd.f32 %v818_v34, %v798_v2  ;;  %v835_v3 = vadd.f32 %v819_v39, %v799_v22  ;;  %v925_v10 = vsel %vm318_vm1, %v923_v1, %v924_v25  ;;  %v1048_v23 = vrot.slane %v986_v7, 2 }
  0xa2   : > { %v927_v11 = vsel %vm318_vm1, %v924_v25, %v926_v40  ;;  %v1050_v12 = vrot.slane %v987_v9, 2 }
  0xa3   : > { %v958_v13 = vadd.f32 %v925_v10, %v834_v36  ;;  %v959_v17 = vadd.f32 %v927_v11, %v835_v3  ;;  %v1049_v28 = vsel %vm443_vm2, %v1047_v0, %v1048_v23 }
  0xa4   : > { %v1051_v63 = vsel %vm443_vm2, %v1048_v23, %v1050_v12 }
  0xa5   : > { %v1082_v8 = vadd.f32 %v1049_v28, %v958_v13  ;;  %v1083_v30 = vadd.f32 %v1051_v63, %v959_v17 }
  0xa7   : > { %v1091_v55 = vpack.c.bf16 %v1083_v30, %v1082_v8 }
  0xa9   : > { %1368 = vmatmul.mubr.msk.bf16.gmra.mrb[4].mxu1 %vm1093_vm3, %v1091_v55 }
 0x125   : > { %v1357_v32 = vpop.f32.mrb[0].mxu0 }
 0x126   : > { %1222 = vst.msk [vmem:[%s2114_s19 + $0x10] sm:$0xff] %vm1219_vm4, %v1357_v32  ;;  %v1156_v19 = vpop.f32.mrb[1].mxu0 }
 0x127   : > { %1220 = vst.msk [vmem:[%s2114_s19] sm:$0xff] %vm1219_vm4, %v1156_v19  ;;  %v1358_v14 = vpop.f32.mrb[2].mxu0 }
 0x128   : > { %1223 = vst.msk [vmem:[%s2114_s19 + $0x18] sm:$0xff] %vm1219_vm4, %v1358_v14  ;;  %v1159_v58 = vpop.f32.mrb[3].mxu0 }
 0x129   : > { %1221 = vst.msk [vmem:[%s2114_s19 + $0x8] sm:$0xff] %vm1219_vm4, %v1159_v58 }
 0x136   : > { %v1365_v26 = vpop.f32.mrb[0].mxu1 }
 0x137   : > { %1230 = vst.msk [vmem:[%s2114_s19 + $0x50] sm:$0xff] %vm1219_vm4, %v1365_v26  ;;  %v1188_v33 = vpop.f32.mrb[1].mxu1 }
 0x138   : > { %1228 = vst.msk [vmem:[%s2114_s19 + $0x40] sm:$0xff] %vm1219_vm4, %v1188_v33  ;;  %v1366_v62 = vpop.f32.mrb[2].mxu1 }
 0x139   : > { %1231 = vst.msk [vmem:[%s2114_s19 + $0x58] sm:$0xff] %vm1219_vm4, %v1366_v62  ;;  %v1191_v35 = vpop.f32.mrb[3].mxu1 }
 0x13a   : > { %1229 = vst.msk [vmem:[%s2114_s19 + $0x48] sm:$0xff] %vm1219_vm4, %v1191_v35 }
 0x16a   : > { %v1361_v15 = vpop.f32.mrb[4].mxu0 }
 0x16b   : > { %1226 = vst.msk [vmem:[%s2114_s19 + $0x30] sm:$0xff] %vm1219_vm4, %v1361_v15  ;;  %v1172_v27 = vpop.f32.mrb[5].mxu0 }
 0x16c   : > { %1224 = vst.msk [vmem:[%s2114_s19 + $0x20] sm:$0xff] %vm1219_vm4, %v1172_v27  ;;  %v1362_v42 = vpop.f32.mrb[6].mxu0 }
 0x16d   : > { %1227 = vst.msk [vmem:[%s2114_s19 + $0x38] sm:$0xff] %vm1219_vm4, %v1362_v42  ;;  %v1175_v5 = vpop.f32.mrb[7].mxu0 }
 0x16e   : > { %1225 = vst.msk [vmem:[%s2114_s19 + $0x28] sm:$0xff] %vm1219_vm4, %v1175_v5 }
 0x17c   : > { %v1369_v6 = vpop.f32.mrb[4].mxu1 }
 0x17d   : > { %1234 = vst.msk [vmem:[%s2114_s19 + $0x70] sm:$0xff] %vm1219_vm4, %v1369_v6  ;;  %v1204_v16 = vpop.f32.mrb[5].mxu1 }
 0x17e   : > { %1232 = vst.msk [vmem:[%s2114_s19 + $0x60] sm:$0xff] %vm1219_vm4, %v1204_v16  ;;  %v1370_v4 = vpop.f32.mrb[6].mxu1 }
 0x17f   : > { %1235 = vst.msk [vmem:[%s2114_s19 + $0x78] sm:$0xff] %vm1219_vm4, %v1370_v4  ;;  %v1207_v46 = vpop.f32.mrb[7].mxu1 }
 0x180   : > { %1233 = vst.msk [vmem:[%s2114_s19 + $0x68] sm:$0xff] %vm1219_vm4, %v1207_v46 }
 0x181 PF: > { %s13_s16 = sadd.s32 1, %s1455_s16   ;;  %s2167_s12 = smov %s1447_s14 }
 0x182   : > { %p10_p7 = scmp.ge.s32.totalorder %s13_s16, 6   ;;  %s2168_s13 = smov %s1451_s15 }
 0x183   : > { %s2169_s14 = smov %s2172_s17  ;;  %s2170_s15 = smov %s2176_s18 }
 0x184   :  { %12 = sbr.rel (!%p10_p7) target bundleno = 3 (0x3), region = 63 }

</bundles_post_ra>
